<compile_context>
chip_gen: v5e
topology: v5e:2x2
jax: 0.10.0
libtpu: 0.0.40
codegen_flags: <defaults>
</compile_context>

<pallas_src>
import functools

import jax
import jax.numpy as jnp
from jax import lax
from jax.experimental import pallas as pl
from jax.experimental.pallas import tpu as pltpu

# ---------------- model hyper-params (small, consistent with the module) ----
FEAT_DIM = 1000            # resnet50.fc.out_features
FEAT_PAD = 1024            # K padded to a multiple of 128 for clean MXU tiles
HIDDEN   = 32              # hidden_dim
N_LAYERS = 2               # n_layers
AC_DIM   = 4               # ac_dim
HEAD     = AC_DIM + 1      # fused actor(4) | critic(1) head width
BATCH    = 2
BIAS_SLAB = 8              # each bias gets its own sublane-aligned 8-row slab


def _packed_rows(n_layers):
    """Row count of the single packed bf16 weight buffer."""
    return FEAT_PAD + (n_layers + 1) * HIDDEN + (n_layers + 2) * BIAS_SLAB


def _ac_kernel(n_layers, x_ref, w_ref, out_ref):
    """Fused MLP head: Linear -> (Linear+Tanh)*n -> fused {softmax probs | v}.

    x_ref:  [B_pad, FEAT_PAD]        bf16  zero-padded resnet features
    w_ref:  [_packed_rows(n), H]     bf16  single packed weight buffer:
            rows [0, FEAT_PAD)                       : w0 (zero-padded K)
            rows [FEAT_PAD + i*H, FEAT_PAD+(i+1)*H)  : hidden weight i (i < n)
            rows [FEAT_PAD + n*H, FEAT_PAD+(n+1)*H)  : fused head weight (wa|wc|0)
            row  b_base + 0*8                        : b0
            row  b_base + (1+i)*8                    : hidden bias i
            row  b_base + (1+n)*8                    : fused head bias (ba|bc|0)
            (b_base = FEAT_PAD + (n+1)*H; every bias row is 8-row aligned)
    out_ref: [B_pad, H] f32  (cols 0..AC_DIM-1 = probs, col AC_DIM = v, rest 0)
    """
    H = HIDDEN
    w_base = FEAT_PAD
    b_base = FEAT_PAD + (n_layers + 1) * H

    def bias(i):
        r = b_base + i * BIAS_SLAB            # sublane-aligned start
        return w_ref[r:r + 1, :]

    # First projection: Linear(FEAT_PAD -> H). bf16 operands, f32 accumulate.
    h = jnp.dot(x_ref[...], w_ref[0:FEAT_PAD, :],
                preferred_element_type=jnp.float32) + bias(0)

    # Hidden stack: n_layers x (Linear(H, H) + Tanh). Static unroll, f32 math
    # outside the MXU (tanh stays f32: v5e has no bf16 VPU/EUP).
    for i in range(n_layers):
        w = w_ref[w_base + i * H:w_base + (i + 1) * H, :]
        h = jnp.tanh(jnp.dot(h.astype(jnp.bfloat16), w,
                             preferred_element_type=jnp.float32) + bias(1 + i))

    # Fused actor|critic head: one matmul.
    w_head = w_ref[w_base + n_layers * H:w_base + (n_layers + 1) * H, :]
    head = jnp.dot(h.astype(jnp.bfloat16), w_head,
                   preferred_element_type=jnp.float32) + bias(1 + n_layers)

    # Actor softmax over cols [0, AC_DIM); critic value lives in col AC_DIM.
    # Combine with a column-iota mask and store once (single full-ref vst).
    col = lax.broadcasted_iota(jnp.int32, head.shape, 1)
    is_actor = col < AC_DIM
    logits = jnp.where(is_actor, head, -jnp.inf)
    m = jnp.max(logits, axis=1, keepdims=True)
    e = jnp.where(is_actor, jnp.exp(logits - m), 0.0)
    probs = e / jnp.sum(e, axis=1, keepdims=True)      # exact division: probs sum to 1
    out_ref[...] = jnp.where(is_actor, probs, head)


def prepare_params(params, n_layers=N_LAYERS):
    """One-time preprocessing: pack ALL weights into a single bf16 buffer.

    Call this once when the parameters change (init / optimizer step), cache
    the result, and pass it to `actor_critic_forward` on every call — the
    per-call path then does zero weight repacking.
    """
    w0, b0, wh, bh, wa, ba, wc, bc = params
    H = HIDDEN

    w0_p = jnp.pad(w0, ((0, FEAT_PAD - FEAT_DIM), (0, 0)))            # [1024, H]
    w_head = jnp.pad(jnp.concatenate([wa, wc], axis=1),
                     ((0, 0), (0, H - HEAD)))                          # [H, H]
    b_head = jnp.pad(jnp.concatenate([ba, bc], axis=1),
                     ((0, 0), (0, H - HEAD)))                          # [1, H]

    def slab(b):                                                       # [1,H] -> [8,H]
        return jnp.pad(b, ((0, BIAS_SLAB - 1), (0, 0)))

    blocks = [w0_p]
    blocks += [wh[i] for i in range(n_layers)]                         # hidden weights
    blocks.append(w_head)                                              # fused head weight
    blocks.append(slab(b0))                                            # first-layer bias
    blocks += [slab(bh[i]) for i in range(n_layers)]                   # hidden biases
    blocks.append(slab(b_head))                                        # fused head bias
    packed = jnp.concatenate(blocks, axis=0).astype(jnp.bfloat16)
    assert packed.shape == (_packed_rows(n_layers), H)
    return packed


@functools.partial(jax.jit, static_argnames=("n_layers",))
def actor_critic_forward(feats, packed_w, *, n_layers=N_LAYERS):
    """feats: [B, FEAT_DIM] f32 (frozen resnet50 features); packed_w from prepare_params.

    Returns (probs [B, AC_DIM], v_value [B]) — probs parameterize the
    Categorical action distribution. Note: torch's `.squeeze()` would also
    drop the batch dim when B == 1; here we keep [B, AC_DIM] / [B].
    """
    B = feats.shape[0]
    B_pad = max(8, ((B + 7) // 8) * 8)          # sublane-aligned batch

    # Single fusable pad (batch -> B_pad, K 1000 -> 1024) + bf16 demote.
    feats_p = jnp.pad(feats.astype(jnp.bfloat16),
                      ((0, B_pad - B), (0, FEAT_PAD - FEAT_DIM)))

    vmem = pl.BlockSpec(memory_space=pltpu.MemorySpace.VMEM)
    kernel = functools.partial(_ac_kernel, n_layers)

    flops = 2 * B_pad * (FEAT_PAD * HIDDEN + (n_layers + 1) * HIDDEN * HIDDEN)
    transcendentals = B_pad * (n_layers * HIDDEN + AC_DIM)
    bytes_accessed = (feats_p.size * 2 + packed_w.size * 2
                      + B_pad * HIDDEN * 4)

    out = pl.pallas_call(
        kernel,
        out_shape=jax.ShapeDtypeStruct((B_pad, HIDDEN), jnp.float32),
        in_specs=[vmem, vmem],
        out_specs=vmem,
        cost_estimate=pl.CostEstimate(flops=flops,
                                      transcendentals=transcendentals,
                                      bytes_accessed=bytes_accessed),
    )(feats_p, packed_w)

    probs = out[:B, 0:AC_DIM]
    v_value = out[:B, AC_DIM]
    return probs, v_value


def init_params(key):
    """Deterministic init mimicking nn.Linear default (U[-1/sqrt(fan_in), +])."""
    ks = jax.random.split(key, 8)

    def lin(kw, kb, fan_in, fan_out):
        bound = 1.0 / jnp.sqrt(jnp.float32(fan_in))
        w = jax.random.uniform(kw, (fan_in, fan_out), jnp.float32, -bound, bound)
        b = jax.random.uniform(kb, (1, fan_out), jnp.float32, -bound, bound)
        return w, b

    w0, b0 = lin(ks[0], ks[1], FEAT_DIM, HIDDEN)

    wh_list, bh_list = [], []
    kh = jax.random.split(ks[2], 2 * N_LAYERS)
    for i in range(N_LAYERS):
        w, b = lin(kh[2 * i], kh[2 * i + 1], HIDDEN, HIDDEN)
        wh_list.append(w)
        bh_list.append(b)
    wh = jnp.stack(wh_list)            # [N_LAYERS, H, H]
    bh = jnp.stack(bh_list)            # [N_LAYERS, 1, H]

    wa, ba = lin(ks[3], ks[4], HIDDEN, AC_DIM)
    wc, bc = lin(ks[5], ks[6], HIDDEN, 1)
    return (w0, b0, wh, bh, wa, ba, wc, bc)


def _reference_forward(feats, params):
    """Pure-JAX f32 reference with exact module semantics."""
    w0, b0, wh, bh, wa, ba, wc, bc = params
    h = feats @ w0 + b0
    for i in range(N_LAYERS):
        h = jnp.tanh(h @ wh[i] + bh[i])
    probs = jax.nn.softmax(h @ wa + ba, axis=1)
    v = jnp.squeeze(h @ wc + bc, axis=-1)
    return probs, v


if __name__ == "__main__":
    key = jax.random.PRNGKey(0)
    k_feat, k_params = jax.random.split(key)

    # Synthetic resnet50 feature output for a batch of observations.
    feats = jax.random.normal(k_feat, (BATCH, FEAT_DIM), jnp.float32)
    params = init_params(k_params)

    # One-time weight packing (cached across forward calls).
    packed_w = jax.block_until_ready(prepare_params(params))

    probs, v_value = actor_critic_forward(feats, packed_w)
    jax.block_until_ready((probs, v_value))

    # Sanity check against the f32 reference (kernel uses bf16 matmul operands
    # with f32 accumulation, so tolerance is ~1e-2 level).
    ref_probs, ref_v = _reference_forward(feats, params)
    assert probs.shape == (BATCH, AC_DIM) and v_value.shape == (BATCH,)
    assert jnp.allclose(probs, ref_probs, atol=2e-2, rtol=2e-2)
    assert jnp.allclose(v_value, ref_v, atol=2e-2, rtol=2e-2)
    assert jnp.all(jnp.abs(jnp.sum(probs, axis=1) - 1.0) < 1e-4)

    print("KERNEL_OK")
</pallas_src>

<mosaic_0001>
module attributes {stable_mosaic.version = 11 : i64} {
  func.func @_ac_kernel(%arg0: memref<8x1024xbf16, #tpu.memory_space<vmem>>, %arg1: memref<1152x32xbf16, #tpu.memory_space<vmem>>, %arg2: memref<8x32xf32, #tpu.memory_space<vmem>>) attributes {dimension_semantics = [], scalar_prefetch = 0 : i64, scratch_operands = 0 : i64, tpu.core_type = #tpu.core_type<tc>} {
    %c0 = arith.constant 0 : index
    %c0_0 = arith.constant 0 : index
    %0 = vector.load %arg0[%c0, %c0_0] : memref<8x1024xbf16, #tpu.memory_space<vmem>>, vector<8x1024xbf16>
    %c0_1 = arith.constant 0 : index
    %c0_2 = arith.constant 0 : index
    %1 = vector.load %arg1[%c0_1, %c0_2] : memref<1152x32xbf16, #tpu.memory_space<vmem>>, vector<1024x32xbf16>
    %cst = arith.constant dense<0.000000e+00> : vector<8x32xf32>
    %2 = tpu.matmul %0, %1, %cst {dimension_numbers = #tpu.dot_dimension_numbers<[1], [0], [0], [1], [0, 0, 1, 1], [], []>} : vector<8x1024xbf16>, vector<1024x32xbf16>, vector<8x32xf32> -> vector<8x32xf32>
    %c1120 = arith.constant 1120 : index
    %c0_3 = arith.constant 0 : index
    %3 = vector.load %arg1[%c1120, %c0_3] : memref<1152x32xbf16, #tpu.memory_space<vmem>>, vector<1x32xbf16>
    %4 = arith.extf %3 : vector<1x32xbf16> to vector<1x32xf32>
    %5 = vector.broadcast %4 : vector<1x32xf32> to vector<8x32xf32>
    %6 = arith.addf %2, %5 : vector<8x32xf32>
    %c1024 = arith.constant 1024 : index
    %c0_4 = arith.constant 0 : index
    %7 = vector.load %arg1[%c1024, %c0_4] : memref<1152x32xbf16, #tpu.memory_space<vmem>>, vector<32x32xbf16>
    %8 = arith.truncf %6 : vector<8x32xf32> to vector<8x32xbf16>
    %cst_5 = arith.constant dense<0.000000e+00> : vector<8x32xf32>
    %9 = tpu.matmul %8, %7, %cst_5 {dimension_numbers = #tpu.dot_dimension_numbers<[1], [0], [0], [1], [0, 0, 1, 1], [], []>} : vector<8x32xbf16>, vector<32x32xbf16>, vector<8x32xf32> -> vector<8x32xf32>
    %c1128 = arith.constant 1128 : index
    %c0_6 = arith.constant 0 : index
    %10 = vector.load %arg1[%c1128, %c0_6] : memref<1152x32xbf16, #tpu.memory_space<vmem>>, vector<1x32xbf16>
    %11 = arith.extf %10 : vector<1x32xbf16> to vector<1x32xf32>
    %12 = vector.broadcast %11 : vector<1x32xf32> to vector<8x32xf32>
    %13 = arith.addf %9, %12 : vector<8x32xf32>
    %14 = math.tanh %13 : vector<8x32xf32>
    %c1056 = arith.constant 1056 : index
    %c0_7 = arith.constant 0 : index
    %15 = vector.load %arg1[%c1056, %c0_7] : memref<1152x32xbf16, #tpu.memory_space<vmem>>, vector<32x32xbf16>
    %16 = arith.truncf %14 : vector<8x32xf32> to vector<8x32xbf16>
    %cst_8 = arith.constant dense<0.000000e+00> : vector<8x32xf32>
    %17 = tpu.matmul %16, %15, %cst_8 {dimension_numbers = #tpu.dot_dimension_numbers<[1], [0], [0], [1], [0, 0, 1, 1], [], []>} : vector<8x32xbf16>, vector<32x32xbf16>, vector<8x32xf32> -> vector<8x32xf32>
    %c1136 = arith.constant 1136 : index
    %c0_9 = arith.constant 0 : index
    %18 = vector.load %arg1[%c1136, %c0_9] : memref<1152x32xbf16, #tpu.memory_space<vmem>>, vector<1x32xbf16>
    %19 = arith.extf %18 : vector<1x32xbf16> to vector<1x32xf32>
    %20 = vector.broadcast %19 : vector<1x32xf32> to vector<8x32xf32>
    %21 = arith.addf %17, %20 : vector<8x32xf32>
    %22 = math.tanh %21 : vector<8x32xf32>
    %c1088 = arith.constant 1088 : index
    %c0_10 = arith.constant 0 : index
    %23 = vector.load %arg1[%c1088, %c0_10] : memref<1152x32xbf16, #tpu.memory_space<vmem>>, vector<32x32xbf16>
    %24 = arith.truncf %22 : vector<8x32xf32> to vector<8x32xbf16>
    %cst_11 = arith.constant dense<0.000000e+00> : vector<8x32xf32>
    %25 = tpu.matmul %24, %23, %cst_11 {dimension_numbers = #tpu.dot_dimension_numbers<[1], [0], [0], [1], [0, 0, 1, 1], [], []>} : vector<8x32xbf16>, vector<32x32xbf16>, vector<8x32xf32> -> vector<8x32xf32>
    %c1144 = arith.constant 1144 : index
    %c0_12 = arith.constant 0 : index
    %26 = vector.load %arg1[%c1144, %c0_12] : memref<1152x32xbf16, #tpu.memory_space<vmem>>, vector<1x32xbf16>
    %27 = arith.extf %26 : vector<1x32xbf16> to vector<1x32xf32>
    %28 = vector.broadcast %27 : vector<1x32xf32> to vector<8x32xf32>
    %29 = arith.addf %25, %28 : vector<8x32xf32>
    %30 = tpu.iota {dimensions = array<i32: 1>} : vector<8x32xi32>
    %c4_i32 = arith.constant 4 : i32
    %31 = vector.broadcast %c4_i32 : i32 to vector<8x32xi32>
    %32 = arith.cmpi slt, %30, %31 : vector<8x32xi32>
    %cst_13 = arith.constant 0xFF800000 : f32
    %33 = vector.broadcast %cst_13 : f32 to vector<8x32xf32>
    %34 = arith.select %32, %29, %33 : vector<8x32xi1>, vector<8x32xf32>
    %cst_14 = arith.constant dense<0xFF800000> : vector<8xf32>
    %35 = vector.multi_reduction <maximumf>, %34, %cst_14 [1] : vector<8x32xf32> to vector<8xf32>
    %36 = vector.shape_cast %35 : vector<8xf32> to vector<8x1xf32>
    %37 = vector.broadcast %36 : vector<8x1xf32> to vector<8x32xf32>
    %38 = arith.subf %34, %37 : vector<8x32xf32>
    %39 = math.exp %38 : vector<8x32xf32>
    %cst_15 = arith.constant 0.000000e+00 : f32
    %40 = vector.broadcast %cst_15 : f32 to vector<8x32xf32>
    %41 = arith.select %32, %39, %40 : vector<8x32xi1>, vector<8x32xf32>
    %cst_16 = arith.constant dense<0.000000e+00> : vector<8xf32>
    %42 = vector.multi_reduction <add>, %41, %cst_16 [1] : vector<8x32xf32> to vector<8xf32>
    %43 = vector.shape_cast %42 : vector<8xf32> to vector<8x1xf32>
    %44 = vector.broadcast %43 : vector<8x1xf32> to vector<8x32xf32>
    %45 = arith.divf %41, %44 : vector<8x32xf32>
    %46 = arith.select %32, %45, %29 : vector<8x32xi1>, vector<8x32xf32>
    %c0_17 = arith.constant 0 : index
    %c0_18 = arith.constant 0 : index
    %47 = vector.load %arg2[%c0_17, %c0_18] : memref<8x32xf32, #tpu.memory_space<vmem>>, vector<8x32xf32>
    tpu.vector_store %arg2[%c0_17, %c0_18], %46 {strides = array<i32>} : memref<8x32xf32, #tpu.memory_space<vmem>>, vector<8x32xf32>,
    return
  }
}

</mosaic_0001>

<bundles_post_ra>
// kernel: actor_critic_forward.1
= control target key start
LH: loop header
LB: loop body
LE: loop exit
PB: predicated region body
PF: predicated region fallthrough
CT: control target
= control target key end

     0   :  { %vm683_vm0 = vcmask 261120   ;;  %s1431_s1 = inlined_call_operand.vmem [shape: bf16[1152,32], index: 1, kind: input, shape index: {}]   ;;  %s1432_s0 = inlined_call_operand.vmem [shape: bf16[8,1024], index: 0, kind: input, shape index: {}]   ;;  %s1433_s2 = inlined_call_operand.vmem [shape: f32[8,32], index: 2, kind: output, shape index: {}]  }
   0x1   :  { %v1099_v0 = vld [vmem:[%s1431_s1 + $0x38] sm:$0xff]  ;;  %v1098_v4 = vld [vmem:[%s1431_s1 + $0x30] sm:$0xff]  ;;  %v1097_v8 = vld [vmem:[%s1431_s1 + $0x28] sm:$0xff] }
   0x2   :  { %v1107_v1 = vld [vmem:[%s1431_s1 + $0x78] sm:$0xff]  ;;  %559 = vmatpush.bf16.msra.mxu0 %v1099_v0  ;;  %v1106_v5 = vld [vmem:[%s1431_s1 + $0x70] sm:$0xff]  ;;  %v1105_v9 = vld [vmem:[%s1431_s1 + $0x68] sm:$0xff] }
   0x3   :  { %v1115_v2 = vld [vmem:[%s1431_s1 + $0xb8] sm:$0xff]  ;;  %572 = vmatpush.bf16.msra.mxu1 %v1107_v1  ;;  %v1114_v6 = vld [vmem:[%s1431_s1 + $0xb0] sm:$0xff]  ;;  %v1113_v10 = vld [vmem:[%s1431_s1 + $0xa8] sm:$0xff] }
   0x4   :  { %v1123_v3 = vld [vmem:[%s1431_s1 + $0xf8] sm:$0xff]  ;;  %585 = vmatpush.bf16.msra.mxu2 %v1115_v2  ;;  %v1122_v7 = vld [vmem:[%s1431_s1 + $0xf0] sm:$0xff]  ;;  %v1121_v11 = vld [vmem:[%s1431_s1 + $0xe8] sm:$0xff] }
   0x5   :  { %598 = vmatpush.bf16.msra.mxu3 %v1123_v3  ;;  %v1096_v12 = vld [vmem:[%s1431_s1 + $0x20] sm:$0xff]  ;;  %v1095_v16 = vld [vmem:[%s1431_s1 + $0x18] sm:$0xff]  ;;  %v1094_v20 = vld [vmem:[%s1431_s1 + $0x10] sm:$0xff] }
   0x6   :  { %560 = vmatpush.bf16.msra.mxu0 %v1098_v4  ;;  %v1104_v13 = vld [vmem:[%s1431_s1 + $0x60] sm:$0xff]  ;;  %v1103_v17 = vld [vmem:[%s1431_s1 + $0x58] sm:$0xff]  ;;  %v1102_v21 = vld [vmem:[%s1431_s1 + $0x50] sm:$0xff] }
   0x7   :  { %573 = vmatpush.bf16.msra.mxu1 %v1106_v5  ;;  %v1112_v14 = vld [vmem:[%s1431_s1 + $0xa0] sm:$0xff]  ;;  %v1111_v18 = vld [vmem:[%s1431_s1 + $0x98] sm:$0xff]  ;;  %v1110_v22 = vld [vmem:[%s1431_s1 + $0x90] sm:$0xff] }
   0x8   :  { %586 = vmatpush.bf16.msra.mxu2 %v1114_v6  ;;  %v1120_v15 = vld [vmem:[%s1431_s1 + $0xe0] sm:$0xff]  ;;  %v1119_v19 = vld [vmem:[%s1431_s1 + $0xd8] sm:$0xff]  ;;  %v1118_v23 = vld [vmem:[%s1431_s1 + $0xd0] sm:$0xff] }
   0x9   :  { %599 = vmatpush.bf16.msra.mxu3 %v1122_v7  ;;  %v1093_v24 = vld [vmem:[%s1431_s1 + $0x8] sm:$0xff]  ;;  %v12_v29 = vld [vmem:[%s1432_s0] sm:$0xff]  ;;  %v1131_v38 = vld [vmem:[%s1431_s1 + $0x138] sm:$0xff] }
   0xa   :  { %561 = vmatpush.bf16.msra.mxu0 %v1097_v8  ;;  %v1101_v25 = vld [vmem:[%s1431_s1 + $0x48] sm:$0xff]  ;;  %v1092_v30 = vld [vmem:[%s1431_s1] sm:$0xff]  ;;  %v151_v33 = vunpack.c.l.b16 %v12_v29  ;;  %v152_v37 = vunpack.c.h.b16 %v12_v29  ;;  %v1139_v39 = vld [vmem:[%s1431_s1 + $0x178] sm:$0xff] }
   0xb   :  { %574 = vmatpush.bf16.msra.mxu1 %v1105_v9  ;;  %v1109_v26 = vld [vmem:[%s1431_s1 + $0x88] sm:$0xff]  ;;  %v1100_v31 = vld [vmem:[%s1431_s1 + $0x40] sm:$0xff]  ;;  %v1147_v40 = vld [vmem:[%s1431_s1 + $0x1b8] sm:$0xff] }
   0xc   :  { %587 = vmatpush.bf16.msra.mxu2 %v1113_v10  ;;  %v1117_v27 = vld [vmem:[%s1431_s1 + $0xc8] sm:$0xff]  ;;  %v1108_v34 = vld [vmem:[%s1431_s1 + $0x80] sm:$0xff]  ;;  %v1155_v41 = vld [vmem:[%s1431_s1 + $0x1f8] sm:$0xff]  ;;  %v159_v43 = vpack.c.b16 %v151_v33, %v151_v33  ;;  %v160_v45 = vpack.c.b16 %v152_v37, %v152_v37 }
   0xd   :  { %600 = vmatpush.bf16.msra.mxu3 %v1121_v11  ;;  %v13_v28 = vld [vmem:[%s1432_s0 + $0x8] sm:$0xff]  ;;  %v1116_v35 = vld [vmem:[%s1431_s1 + $0xc0] sm:$0xff]  ;;  %v1130_v46 = vld [vmem:[%s1431_s1 + $0x130] sm:$0xff] }
   0xe   :  { %562 = vmatpush.bf16.msra.mxu0 %v1096_v12  ;;  %v153_v32 = vunpack.c.l.b16 %v13_v28  ;;  %v154_v36 = vunpack.c.h.b16 %v13_v28  ;;  %v1138_v47 = vld [vmem:[%s1431_s1 + $0x170] sm:$0xff]  ;;  %v1129_v50 = vld [vmem:[%s1431_s1 + $0x128] sm:$0xff]  ;;  %v1128_v54 = vld [vmem:[%s1431_s1 + $0x120] sm:$0xff] }
   0xf   :  { %575 = vmatpush.bf16.msra.mxu1 %v1104_v13  ;;  %v1146_v48 = vld [vmem:[%s1431_s1 + $0x1b0] sm:$0xff]  ;;  %v1137_v51 = vld [vmem:[%s1431_s1 + $0x168] sm:$0xff]  ;;  %v1136_v55 = vld [vmem:[%s1431_s1 + $0x160] sm:$0xff] }
  0x10   :  { %588 = vmatpush.bf16.msra.mxu2 %v1112_v14  ;;  %v161_v42 = vpack.c.b16 %v153_v32, %v153_v32  ;;  %v162_v44 = vpack.c.b16 %v154_v36, %v154_v36  ;;  %v1154_v49 = vld [vmem:[%s1431_s1 + $0x1f0] sm:$0xff]  ;;  %v1145_v52 = vld [vmem:[%s1431_s1 + $0x1a8] sm:$0xff]  ;;  %v1144_v56 = vld [vmem:[%s1431_s1 + $0x1a0] sm:$0xff] }
  0x11   :  { %601 = vmatpush.bf16.msra.mxu3 %v1120_v15  ;;  %v1153_v53 = vld [vmem:[%s1431_s1 + $0x1e8] sm:$0xff]  ;;  %v1152_v57 = vld [vmem:[%s1431_s1 + $0x1e0] sm:$0xff]  ;;  %v1127_v58 = vld [vmem:[%s1431_s1 + $0x118] sm:$0xff] }
  0x12   :  { %563 = vmatpush.bf16.msra.mxu0 %v1095_v16  ;;  %v1135_v59 = vld [vmem:[%s1431_s1 + $0x158] sm:$0xff]  ;;  %v1126_v62 = vld [vmem:[%s1431_s1 + $0x110] sm:$0xff]  ;;  %v1125_v2 = vld [vmem:[%s1431_s1 + $0x108] sm:$0xff] }
  0x13   :  { %576 = vmatpush.bf16.msra.mxu1 %v1103_v17  ;;  %v1143_v60 = vld [vmem:[%s1431_s1 + $0x198] sm:$0xff]  ;;  %v1134_v63 = vld [vmem:[%s1431_s1 + $0x150] sm:$0xff]  ;;  %v1133_v3 = vld [vmem:[%s1431_s1 + $0x148] sm:$0xff] }
  0x14   :  { %589 = vmatpush.bf16.msra.mxu2 %v1111_v18  ;;  %v1151_v61 = vld [vmem:[%s1431_s1 + $0x1d8] sm:$0xff]  ;;  %v1142_v0 = vld [vmem:[%s1431_s1 + $0x190] sm:$0xff]  ;;  %v1141_v5 = vld [vmem:[%s1431_s1 + $0x188] sm:$0xff] }
  0x15   :  { %602 = vmatpush.bf16.msra.mxu3 %v1119_v19  ;;  %v1150_v1 = vld [vmem:[%s1431_s1 + $0x1d0] sm:$0xff]  ;;  %v1149_v6 = vld [vmem:[%s1431_s1 + $0x1c8] sm:$0xff]  ;;  %v15_v7 = vld [vmem:[%s1432_s0 + $0x18] sm:$0xff] }
  0x16   :  { %564 = vmatpush.bf16.msra.mxu0 %v1094_v20  ;;  %v14_v4 = vld [vmem:[%s1432_s0 + $0x10] sm:$0xff]  ;;  %v1124_v10 = vld [vmem:[%s1431_s1 + $0x100] sm:$0xff]  ;;  %v157_v12 = vunpack.c.l.b16 %v15_v7  ;;  %v158_v13 = vunpack.c.h.b16 %v15_v7  ;;  %v1157_v20 = vld [vmem:[%s1431_s1 + $0x208] sm:$0xff]  ;;  %v774_v7 = vlaneseq }
  0x17   :  { %577 = vmatpush.bf16.msra.mxu1 %v1102_v21  ;;  %v155_v8 = vunpack.c.l.b16 %v14_v4  ;;  %v156_v9 = vunpack.c.h.b16 %v14_v4  ;;  %v1132_v11 = vld [vmem:[%s1431_s1 + $0x140] sm:$0xff] }
  0x18   :  { %590 = vmatpush.bf16.msra.mxu2 %v1110_v22  ;;  %v1140_v14 = vld [vmem:[%s1431_s1 + $0x180] sm:$0xff]  ;;  %v165_v18 = vpack.c.b16 %v157_v12, %v157_v12  ;;  %v166_v19 = vpack.c.b16 %v158_v13, %v158_v13 }
  0x19   :  { %603 = vmatpush.bf16.msra.mxu3 %v1118_v23  ;;  %v1148_v15 = vld [vmem:[%s1431_s1 + $0x1c0] sm:$0xff]  ;;  %v163_v16 = vpack.c.b16 %v155_v8, %v155_v8  ;;  %v164_v17 = vpack.c.b16 %v156_v9, %v156_v9  ;;  %v775_v9 = vand.u32 127, %v774_v7 }
  0x1a   :  { %565 = vmatpush.bf16.msra.mxu0 %v1093_v24  ;;  %v1156_v22 = vld [vmem:[%s1431_s1 + $0x200] sm:$0xff]  ;;  %v144_v24 = vld [vmem:[%s1431_s1 + $0x230] sm:$0x1] }
  0x1b   :  { %578 = vmatpush.bf16.msra.mxu1 %v1101_v25  ;;  %v145_v28 = vunpack.c.l.bf16 %v144_v24  ;;  %vm776_vm1 = vcmp.lt.s32.totalorder %v775_v9, 4 }
  0x1c   :  { %591 = vmatpush.bf16.msra.mxu2 %v1109_v26 }
  0x1d   :  { %604 = vmatpush.bf16.msra.mxu3 %v1117_v27 }
  0x1e   :  { %566 = vmatpush.bf16.msra.mxu0 %v1092_v30  ;;  %v1159_v30 = vld [vmem:[%s1431_s1 + $0x218] sm:$0xff] }
  0x1f   :  { %579 = vmatpush.bf16.msra.mxu1 %v1100_v31  ;;  %v146_v31 = vperm.slane %v145_v28, 0 }
  0x20   :  { %592 = vmatpush.bf16.msra.mxu2 %v1108_v34 }
  0x21   :  { %605 = vmatpush.bf16.msra.mxu3 %v1116_v35  ;;  %567 = vmatmul.bf16.vlgmr.msra.gmra.mxu0 %v159_v43 }
  0x22   :  { %611 = vmatpush.bf16.msrb.mxu0 %v1131_v38  ;;  %580 = vmatmul.bf16.vlgmr.msra.gmra.mxu1 %v160_v45 }
  0x23   :  { %624 = vmatpush.bf16.msrb.mxu1 %v1139_v39  ;;  %593 = vmatmul.bf16.vlgmr.msra.gmra.mxu2 %v161_v42 }
  0x24   :  { %637 = vmatpush.bf16.msrb.mxu2 %v1147_v40  ;;  %606 = vmatmul.bf16.vlgmr.msra.gmra.mxu3 %v162_v44 }
  0x25   :  { %650 = vmatpush.bf16.msrb.mxu3 %v1155_v41 }
  0x26   :  { %612 = vmatpush.bf16.msrb.mxu0 %v1130_v46 }
  0x27   :  { %625 = vmatpush.bf16.msrb.mxu1 %v1138_v47 }
  0x28   :  { %638 = vmatpush.bf16.msrb.mxu2 %v1146_v48 }
  0x29   :  { %651 = vmatpush.bf16.msrb.mxu3 %v1154_v49 }
  0x2a   :  { %613 = vmatpush.bf16.msrb.mxu0 %v1129_v50 }
  0x2b   :  { %626 = vmatpush.bf16.msrb.mxu1 %v1137_v51  ;;  %v1158_v51 = vld [vmem:[%s1431_s1 + $0x210] sm:$0xff] }
  0x2c   :  { %639 = vmatpush.bf16.msrb.mxu2 %v1145_v52  ;;  %v1161_v52 = vld [vmem:[%s1431_s1 + $0x228] sm:$0xff] }
  0x2d   :  { %652 = vmatpush.bf16.msrb.mxu3 %v1153_v53  ;;  %v668_v53 = vld [vmem:[%s1431_s1 + $0x234] sm:$0x1] }
  0x2e   :  { %614 = vmatpush.bf16.msrb.mxu0 %v1128_v54  ;;  %v669_v54 = vunpack.c.l.bf16 %v668_v53 }
  0x2f   :  { %627 = vmatpush.bf16.msrb.mxu1 %v1136_v55 }
  0x30   :  { %640 = vmatpush.bf16.msrb.mxu2 %v1144_v56  ;;  %v670_v55 = vperm.slane %v669_v54, 0 }
  0x31   :  { %653 = vmatpush.bf16.msrb.mxu3 %v1152_v57 }
  0x32   :  { %615 = vmatpush.bf16.msrb.mxu0 %v1127_v58 }
  0x33   :  { %628 = vmatpush.bf16.msrb.mxu1 %v1135_v59 }
  0x34   :  { %641 = vmatpush.bf16.msrb.mxu2 %v1143_v60 }
  0x35   :  { %654 = vmatpush.bf16.msrb.mxu3 %v1151_v61  ;;  %v1160_v61 = vld [vmem:[%s1431_s1 + $0x220] sm:$0xff] }
  0x36   :  { %616 = vmatpush.bf16.msrb.mxu0 %v1126_v62  ;;  %v706_v62 = vld [vmem:[%s1431_s1 + $0x238] sm:$0x1] }
  0x37   :  { %629 = vmatpush.bf16.msrb.mxu1 %v1134_v63  ;;  %v707_v63 = vunpack.c.l.bf16 %v706_v62 }
  0x38   :  { %642 = vmatpush.bf16.msrb.mxu2 %v1142_v0 }
  0x39   :  { %655 = vmatpush.bf16.msrb.mxu3 %v1150_v1  ;;  %v708_v0 = vperm.slane %v707_v63, 0 }
  0x3a   :  { %617 = vmatpush.bf16.msrb.mxu0 %v1125_v2 }
  0x3b   :  { %630 = vmatpush.bf16.msrb.mxu1 %v1133_v3 }
  0x3c   :  { %643 = vmatpush.bf16.msrb.mxu2 %v1141_v5 }
  0x3d   :  { %656 = vmatpush.bf16.msrb.mxu3 %v1149_v6  ;;  %v743_v6 = vld [vmem:[%s1431_s1 + $0x23c] sm:$0x1] }
  0x3e   :  { %618 = vmatpush.bf16.msrb.mxu0 %v1124_v10  ;;  %v744_v8 = vunpack.c.l.bf16 %v743_v6 }
  0x3f   :  { %631 = vmatpush.bf16.msrb.mxu1 %v1132_v11 }
  0x40   :  { %644 = vmatpush.bf16.msrb.mxu2 %v1140_v14  ;;  %v745_v10 = vperm.slane %v744_v8, 0 }
  0x41   :  { %657 = vmatpush.bf16.msrb.mxu3 %v1148_v15  ;;  %619 = vmatmul.bf16.vlgmr.msrb.gmra.mxu0 %v163_v16 }
  0x42   :  { %632 = vmatmul.bf16.vlgmr.msrb.gmra.mxu1 %v164_v17  ;;  %693 = vmatpush.bf16.msra.mxu0 %v1157_v20 }
  0x43   :  { %645 = vmatmul.bf16.vlgmr.msrb.gmra.mxu2 %v165_v18  ;;  %730 = vmatpush.bf16.msra.mxu1 %v1159_v30 }
  0x44   :  { %658 = vmatmul.bf16.vlgmr.msrb.gmra.mxu3 %v166_v19  ;;  %767 = vmatpush.bf16.msra.mxu2 %v1161_v52 }
  0x46   :  { %694 = vmatpush.bf16.msra.mxu0 %v1156_v22 }
  0x47   :  { %731 = vmatpush.bf16.msra.mxu1 %v1158_v51 }
  0x48   :  { %768 = vmatpush.bf16.msra.mxu2 %v1160_v61 }
  0x9e   :  { %v568_v21 = vpop.f32.mrf.mxu0 }
  0x9f   :  { %v581_v23 = vpop.f32.mrf.mxu1  ;;  %v569_v34 = vadd.f32 %v568_v21, %v146_v31 }
  0xa1   :  { %v582_v35 = vadd.f32 %v581_v23, %v569_v34 }
  0xa6   :  { %v594_v25 = vpop.f32.mrf.mxu2  ;;  %v570_v27 = vpop.f32.mrf.mxu0 }
  0xa7   :  { %v607_v26 = vpop.f32.mrf.mxu3  ;;  %v583_v29 = vpop.f32.mrf.mxu1  ;;  %v595_v36 = vadd.f32 %v594_v25, %v582_v35 }
  0xa9   :  { %v608_v37 = vadd.f32 %v607_v26, %v595_v36 }
  0xae   :  { %v596_v32 = vpop.f32.mrf.mxu2 }
  0xaf   :  { %v609_v33 = vpop.f32.mrf.mxu3 }
  0xbe   :  { %v620_v38 = vpop.f32.mrf.mxu0 }
  0xbf   :  { %v633_v39 = vpop.f32.mrf.mxu1  ;;  %v621_v40 = vadd.f32 %v620_v38, %v608_v37 }
  0xc1   :  { %v634_v41 = vadd.f32 %v633_v39, %v621_v40 }
  0xc6   :  { %v646_v42 = vpop.f32.mrf.mxu2  ;;  %v622_v45 = vpop.f32.mrf.mxu0 }
  0xc7   :  { %v659_v43 = vpop.f32.mrf.mxu3  ;;  %v647_v44 = vadd.f32 %v646_v42, %v634_v41  ;;  %v635_v46 = vpop.f32.mrf.mxu1 }
  0xc9   :  { %v660_v47 = vadd.f32 %v659_v43, %v647_v44 }
  0xcb   :  { %v667_v48 = vpack.c.bf16 %v660_v47, %v660_v47 }
  0xcd   :  { %1073 = vmatmul.msk.bf16.vlgmr.msra.gmra.mxu0 %vm683_vm0, %v667_v48 }
  0xce   :  { %v648_v49 = vpop.f32.mrf.mxu2 }
  0xcf   :  { %v661_v50 = vpop.f32.mrf.mxu3 }
 0x14a   :  { %v696_v56 = vpop.f32.mrf.mxu0 }
 0x14b   :  { %v697_v57 = vadd.f32 %v696_v56, %v670_v55 }
 0x14d   :  { %1162 = vtanh.f32 %v697_v57 }
 0x152   :  { %v698_v58 = vpop.f32.mrf.mxu0 }
 0x153   :  { %v1163_v59 = vpop.eup %1162 }
 0x154   :  { %v705_v60 = vpack.c.bf16 %v1163_v59, %v1163_v59 }
 0x156   :  { %1082 = vmatmul.msk.bf16.vlgmr.msra.gmra.mxu1 %vm683_vm0, %v705_v60 }
 0x1d3   :  { %v733_v1 = vpop.f32.mrf.mxu1 }
 0x1d4   :  { %v734_v2 = vadd.f32 %v733_v1, %v708_v0 }
 0x1d6   :  { %1164 = vtanh.f32 %v734_v2 }
 0x1db   :  { %v735_v3 = vpop.f32.mrf.mxu1 }
 0x1dc   :  { %v1165_v4 = vpop.eup %1164 }
 0x1dd   :  { %v742_v5 = vpack.c.bf16 %v1165_v4, %v1165_v4 }
 0x1df   :  { %1091 = vmatmul.msk.bf16.vlgmr.msra.gmra.mxu2 %vm683_vm0, %v742_v5 }
 0x262   :  { %v770_v11 = vpop.f32.mrf.mxu2 }
 0x263   :  { %v771_v12 = vadd.f32 %v770_v11, %v745_v10 }
 0x265   :  { %v777_v13 = vsel %vm776_vm1, %v771_v12, -inf }
 0x266   :  { %v778_v14 = vsel %vm683_vm0, %v777_v13, -inf }
 0x267   :  { %779 = vmax.xlane.f32.xlu0 %v778_v14 }
 0x26a   :  { %v772_v15 = vpop.f32.mrf.mxu2 }
 0x2da   :  { %v780_v16 = vpop.xlane.xlu0 %779 }
 0x2db   :  { %v781_v17 = vsub.f32 %v777_v13, %v780_v16 }
 0x2dd   :  { %v782_v18 = vmul.f32 1.442695, %v781_v17 }
 0x2df   :  { %1166 = vpow2.f32 %v782_v18 }
 0x2e5   :  { %v1167_v19 = vpop.eup %1166 }
 0x2e6   :  { %v784_v20 = vsel %vm776_vm1, %v1167_v19, 0.0 }
 0x2e7   :  { %v785_v21 = vsel %vm683_vm0, %v784_v20, 0.0 }
 0x2e8   :  { %786 = vadd.xlane.f32.xlu0 %v785_v21 }
 0x35b   :  { %v787_v22 = vpop.xlane.xlu0 %786 }
 0x35c   :  { %1168 = vrcp.f32 %v787_v22  ;;  %v799_v26 = vand.u32 2147483648, %v787_v22  ;;  %v797_v28 = vand.u32 2147483647, %v787_v22  ;;  %vm793_vm3 = vweird.f32 %v787_v22 }
 0x35e   :  { %v800_v30 = vor.u32 1.1754944e-38, %v799_v26  ;;  %vm798_vm5 = vcmp.eq.f32.partialorder %v797_v28, 8.507059e+37 }
 0x362   :  { %v1169_v23 = vpop.eup %1168 }
 0x363   :  { %v789_v24 = vmul.f32 %v1169_v23, %v787_v22  ;;  %vm794_vm2 = vweird.f32 %v1169_v23 }
 0x364   :  { %vm795_vm4 = vmor %vm793_vm3, %vm794_vm2 }
 0x365   :  { %v790_v25 = vsub.f32 1.0, %v789_v24 }
 0x367   :  { %v791_v27 = vmul.f32 %v1169_v23, %v790_v25 }
 0x369   :  { %v792_v29 = vadd.f32 %v1169_v23, %v791_v27 }
 0x36b   :  { %v796_v31 = vsel %vm795_vm4, %v1169_v23, %v792_v29 }
 0x36c   :  { %v801_v32 = vsel %vm798_vm5, %v800_v30, %v796_v31 }
 0x36d   :  { %v802_v33 = vmul.f32 %v801_v32, %v784_v20 }
 0x36f   :  { %v803_v34 = vsel %vm776_vm1, %v802_v33, %v771_v12 }
 0x370   :  { %804 = vst.msk [vmem:[%s1433_s2] sm:$0xff] %vm683_vm0, %v803_v34 }

</bundles_post_ra>
